<compile_context>
chip_gen: v7x
topology: tpu7x:2x2x1
jax: 0.10.0
libtpu: 0.0.40
codegen_flags: <defaults>
</compile_context>

<pallas_src>
import functools
import math

import jax
import jax.numpy as jnp
from jax import lax
from jax.experimental import pallas as pl
from jax.experimental.pallas import tpu as pltpu

LRELU_SLOPE = 0.2
LRELU_GAIN = math.sqrt(2.0)  # def_gain of 'lrelu' in bias_act


def _enc_from_rgb_kernel(x_ref, params_ref, w1_ref, masks_ref, o_ref, p_ref, *,
                         width):
    # x_ref     : (1, Cin, HW)    one batch element, channels on sublanes
    # params_ref: (Cout, Cin+2)   packed [gained w0 columns | b0 | b1*sqrt(2)]
    # w1_ref    : (Cout, 9*Cout)  bf16 3x3 weights, gains folded, cols (tap, ci)
    # masks_ref : (9, HW)         f32 0/1 halo-validity mask per 3x3 tap
    # o_ref     : (1, Cout, HW)
    # p_ref     : (9*Cout, HW)    bf16 scratch holding the shifted taps
    _, cin, hw = x_ref.shape
    cout = o_ref.shape[1]
    w = width

    x = x_ref[0]                                           # (Cin, HW) f32

    # ---- conv0: 1x1 conv as Cin VPU broadcast-FMAs + bias + lrelu ----------
    # (Its sqrt(2) activation gain is folded into w1 wrapper-side.)
    y0 = jnp.zeros((cout, hw), jnp.float32)
    for ci in range(cin):
        # (Cout,1) * (1,HW) -> (Cout,HW): pure VPU work, MXU stays free.
        y0 = y0 + params_ref[:, ci:ci + 1] * x[ci:ci + 1, :]
    y0 = y0 + params_ref[:, cin:cin + 1]                   # + b0
    y0 = jnp.where(y0 >= 0.0, y0, y0 * LRELU_SLOPE)

    # ---- conv1: 3x3 conv (pad=1) as ONE K = 9*Cout MXU matmul --------------
    # Each tap = XLU lane rotation of y0; the out-of-image halo is zeroed with
    # a precomputed 1-sublane 0/1 mask (broadcast multiply).  Taps go straight
    # into the bf16 scratch so at most one tap is live in vregs at a time.
    for k in range(9):
        dy = k // 3 - 1
        dx = k % 3 - 1
        off = dy * w + dx                                  # flat source offset
        if off == 0:
            tap = y0                                       # mask is all-ones
        else:
            # shifted[i] = y0[(i + off) mod HW]  (XLU rotate on the lane axis)
            shifted = pltpu.roll(y0, shift=(-off) % hw, axis=1)
            tap = shifted * masks_ref[k:k + 1, :]          # zero the halo
        p_ref[pl.ds(k * cout, cout), :] = tap.astype(p_ref.dtype)

    y1 = jnp.dot(w1_ref[...], p_ref[...],                  # bf16 x bf16 -> f32
                 preferred_element_type=jnp.float32)
    y1 = y1 + params_ref[:, cin + 1:cin + 2]               # + b1*sqrt(2)
    # conv1's output sqrt(2) gain is folded into w1/b1 (lrelu is pos.-homog.).
    y1 = jnp.where(y1 >= 0.0, y1, y1 * LRELU_SLOPE)

    o_ref[0] = y1.astype(o_ref.dtype)


def enc_from_rgb(x_nchw, w0_oihw, b0, w1_oihw, b1):
    """x_nchw: (N, Cin, H, W). Weights in PyTorch OIHW layout. Returns NCHW."""
    N, Cin, H, W = x_nchw.shape
    Cout = w0_oihw.shape[0]
    HW = H * W

    # -------- parameter prep (tiny, plain JAX, once per call) ---------------
    g0 = 1.0 / math.sqrt(Cin * 1 * 1)          # conv0 weight gain (1x1)
    g1 = 1.0 / math.sqrt(Cout * 3 * 3)         # conv1 weight gain (3x3)
    # Fold conv0's lrelu gain sqrt(2) AND conv1's own output lrelu gain sqrt(2)
    # into w1 (total x2); conv1's output gain also scales b1 by sqrt(2).
    w1_scale = g1 * LRELU_GAIN * LRELU_GAIN
    # (Cout, 9*Cout): column block k = dy*3+dx holds w1[:, :, dy, dx].
    w1 = jnp.transpose(w1_oihw * w1_scale, (0, 2, 3, 1)).reshape(Cout, 9 * Cout)
    w1 = w1.astype(jnp.bfloat16)
    # Packed small params: [w0 columns (Cout, Cin)*g0 | b0 | b1*sqrt(2)].
    params = jnp.concatenate(
        [w0_oihw[:, :, 0, 0] * g0,
         b0.reshape(Cout, 1),
         b1.reshape(Cout, 1) * LRELU_GAIN],
        axis=1).astype(jnp.float32)                        # (Cout, Cin+2)

    # Precomputed halo-validity masks, one lane-dense row per 3x3 tap.
    rows = jnp.arange(H, dtype=jnp.int32).reshape(H, 1)
    cols = jnp.arange(W, dtype=jnp.int32).reshape(1, W)
    mask_rows = []
    for k in range(9):
        dy, dx = k // 3 - 1, k % 3 - 1
        m = ((rows + dy >= 0) & (rows + dy < H)
             & (cols + dx >= 0) & (cols + dx < W))
        mask_rows.append(m.reshape(HW))
    masks = jnp.stack(mask_rows).astype(jnp.float32)       # (9, HW)

    # Free reshape (trailing dims only): stays NCHW, no HBM transpose.
    x_flat = x_nchw.reshape(N, Cin, HW)

    out_flat = pl.pallas_call(
        functools.partial(_enc_from_rgb_kernel, width=W),
        out_shape=jax.ShapeDtypeStruct((N, Cout, HW), jnp.float32),
        grid_spec=pltpu.PrefetchScalarGridSpec(
            num_scalar_prefetch=0,
            grid=(N,),
            in_specs=[
                pl.BlockSpec((1, Cin, HW), lambda n: (n, 0, 0)),
                pl.BlockSpec((Cout, Cin + 2), lambda n: (0, 0)),
                pl.BlockSpec((Cout, 9 * Cout), lambda n: (0, 0)),
                pl.BlockSpec((9, HW), lambda n: (0, 0)),
            ],
            out_specs=pl.BlockSpec((1, Cout, HW), lambda n: (n, 0, 0)),
            scratch_shapes=[pltpu.VMEM((9 * Cout, HW), jnp.bfloat16)],
        ),
        compiler_params=pltpu.CompilerParams(
            dimension_semantics=("parallel",)),
    )(x_flat, params, w1, masks)

    return out_flat.reshape(N, Cout, H, W)


def _ref_forward(x_nchw, w0_oihw, b0, w1_oihw, b1):
    """Pure-JAX f32 reference mirroring Conv2dLayer -> Conv2dLayer (lrelu)."""
    Cin = x_nchw.shape[1]
    Cout = w0_oihw.shape[0]
    dn = ("NCHW", "OIHW", "NCHW")

    g0 = 1.0 / math.sqrt(Cin * 1 * 1)
    y = lax.conv_general_dilated(x_nchw, w0_oihw * g0, (1, 1), "SAME",
                                 dimension_numbers=dn)
    y = y + b0.reshape(1, -1, 1, 1)
    y = jnp.where(y >= 0.0, y, y * LRELU_SLOPE) * LRELU_GAIN

    g1 = 1.0 / math.sqrt(Cout * 3 * 3)
    y = lax.conv_general_dilated(y, w1_oihw * g1, (1, 1), "SAME",
                                 dimension_numbers=dn)
    y = y + b1.reshape(1, -1, 1, 1)
    y = jnp.where(y >= 0.0, y, y * LRELU_SLOPE) * LRELU_GAIN
    return y


if __name__ == "__main__":
    # Small, PyTorch-consistent shapes: EncFromRGB(in_channels=4, out_channels=32)
    N, Cin, H, W = 2, 4, 16, 16
    Cout = 32

    key = jax.random.PRNGKey(0)
    kx, kw0, kb0, kw1, kb1 = jax.random.split(key, 5)

    x = jax.random.normal(kx, (N, Cin, H, W), dtype=jnp.float32)
    # Deterministic synthetic parameters (shapes per Conv2dLayer.__init__).
    w0 = jax.random.normal(kw0, (Cout, Cin, 1, 1), dtype=jnp.float32)
    b0 = 0.1 * jax.random.normal(kb0, (Cout,), dtype=jnp.float32)
    w1 = jax.random.normal(kw1, (Cout, Cout, 3, 3), dtype=jnp.float32)
    b1 = 0.1 * jax.random.normal(kb1, (Cout,), dtype=jnp.float32)

    out = enc_from_rgb(x, w0, b0, w1, b1)
    out = jax.block_until_ready(out)

    ref = jax.block_until_ready(_ref_forward(x, w0, b0, w1, b1))
    assert out.shape == (N, Cout, H, W), out.shape
    # Tolerance loosened vs the f32 version: conv1 runs in bf16 on the MXU
    # (f32 accumulation); observed error is ~1e-2 worst case at these shapes.
    assert jnp.allclose(out, ref, atol=5e-2, rtol=5e-2), \
        float(jnp.max(jnp.abs(out - ref)))

    print("KERNEL_OK")
</pallas_src>

<mosaic_0001>
module attributes {stable_mosaic.version = 11 : i64} {
  func.func @_enc_from_rgb_kernel(%arg0: i32, %arg1: memref<1x4x256xf32, #tpu.memory_space<vmem>>, %arg2: memref<32x6xf32, #tpu.memory_space<vmem>>, %arg3: memref<32x288xbf16, #tpu.memory_space<vmem>>, %arg4: memref<9x256xf32, #tpu.memory_space<vmem>>, %arg5: memref<1x32x256xf32, #tpu.memory_space<vmem>>, %arg6: memref<288x256xbf16, #tpu.memory_space<vmem>>) attributes {dimension_semantics = [#tpu.dimension_semantics<parallel>], iteration_bounds = array<i64: 2>, scalar_prefetch = 0 : i64, scratch_operands = 1 : i64, tpu.core_type = #tpu.core_type<tc>, window_params = [{transform_indices = @transform_0, window_bounds = array<i64: 1, 4, 256>}, {pipeline_mode = #tpu.pipeline_mode<synchronous>, transform_indices = @transform_1, window_bounds = array<i64: 32, 6>}, {pipeline_mode = #tpu.pipeline_mode<synchronous>, transform_indices = @transform_2, window_bounds = array<i64: 32, 288>}, {pipeline_mode = #tpu.pipeline_mode<synchronous>, transform_indices = @transform_3, window_bounds = array<i64: 9, 256>}, {transform_indices = @transform_4, window_bounds = array<i64: 1, 32, 256>}]} {
    %c0 = arith.constant 0 : index
    %c0_0 = arith.constant 0 : index
    %c0_1 = arith.constant 0 : index
    %0 = vector.load %arg1[%c0, %c0_0, %c0_1] : memref<1x4x256xf32, #tpu.memory_space<vmem>>, vector<1x4x256xf32>
    %1 = vector.shape_cast %0 : vector<1x4x256xf32> to vector<4x256xf32>
    %cst = arith.constant 0.000000e+00 : f32
    %2 = vector.broadcast %cst : f32 to vector<32x256xf32>
    %c0_2 = arith.constant 0 : index
    %c0_3 = arith.constant 0 : index
    %3 = vector.load %arg2[%c0_2, %c0_3] : memref<32x6xf32, #tpu.memory_space<vmem>>, vector<32x1xf32>
    %4 = vector.extract_strided_slice %1 {offsets = [0, 0], sizes = [1, 256], strides = [1, 1]} : vector<4x256xf32> to vector<1x256xf32>
    %5 = vector.broadcast %3 : vector<32x1xf32> to vector<32x256xf32>
    %6 = vector.broadcast %4 : vector<1x256xf32> to vector<32x256xf32>
    %7 = arith.mulf %5, %6 : vector<32x256xf32>
    %8 = arith.addf %2, %7 : vector<32x256xf32>
    %c0_4 = arith.constant 0 : index
    %c1 = arith.constant 1 : index
    %9 = vector.load %arg2[%c0_4, %c1] : memref<32x6xf32, #tpu.memory_space<vmem>>, vector<32x1xf32>
    %10 = vector.extract_strided_slice %1 {offsets = [1, 0], sizes = [1, 256], strides = [1, 1]} : vector<4x256xf32> to vector<1x256xf32>
    %11 = vector.broadcast %9 : vector<32x1xf32> to vector<32x256xf32>
    %12 = vector.broadcast %10 : vector<1x256xf32> to vector<32x256xf32>
    %13 = arith.mulf %11, %12 : vector<32x256xf32>
    %14 = arith.addf %8, %13 : vector<32x256xf32>
    %c0_5 = arith.constant 0 : index
    %c2 = arith.constant 2 : index
    %15 = vector.load %arg2[%c0_5, %c2] : memref<32x6xf32, #tpu.memory_space<vmem>>, vector<32x1xf32>
    %16 = vector.extract_strided_slice %1 {offsets = [2, 0], sizes = [1, 256], strides = [1, 1]} : vector<4x256xf32> to vector<1x256xf32>
    %17 = vector.broadcast %15 : vector<32x1xf32> to vector<32x256xf32>
    %18 = vector.broadcast %16 : vector<1x256xf32> to vector<32x256xf32>
    %19 = arith.mulf %17, %18 : vector<32x256xf32>
    %20 = arith.addf %14, %19 : vector<32x256xf32>
    %c0_6 = arith.constant 0 : index
    %c3 = arith.constant 3 : index
    %21 = vector.load %arg2[%c0_6, %c3] : memref<32x6xf32, #tpu.memory_space<vmem>>, vector<32x1xf32>
    %22 = vector.extract_strided_slice %1 {offsets = [3, 0], sizes = [1, 256], strides = [1, 1]} : vector<4x256xf32> to vector<1x256xf32>
    %23 = vector.broadcast %21 : vector<32x1xf32> to vector<32x256xf32>
    %24 = vector.broadcast %22 : vector<1x256xf32> to vector<32x256xf32>
    %25 = arith.mulf %23, %24 : vector<32x256xf32>
    %26 = arith.addf %20, %25 : vector<32x256xf32>
    %c0_7 = arith.constant 0 : index
    %c4 = arith.constant 4 : index
    %27 = vector.load %arg2[%c0_7, %c4] : memref<32x6xf32, #tpu.memory_space<vmem>>, vector<32x1xf32>
    %28 = vector.broadcast %27 : vector<32x1xf32> to vector<32x256xf32>
    %29 = arith.addf %26, %28 : vector<32x256xf32>
    %cst_8 = arith.constant 0.000000e+00 : f32
    %30 = vector.broadcast %cst_8 : f32 to vector<32x256xf32>
    %31 = arith.cmpf oge, %29, %30 : vector<32x256xf32>
    %cst_9 = arith.constant 2.000000e-01 : f32
    %32 = vector.broadcast %cst_9 : f32 to vector<32x256xf32>
    %33 = arith.mulf %29, %32 : vector<32x256xf32>
    %34 = arith.select %31, %29, %33 : vector<32x256xi1>, vector<32x256xf32>
    %c17_i32 = arith.constant 17 : i32
    %35 = tpu.dynamic_rotate %34 by %c17_i32 dim 1 : vector<32x256xf32>, i32 -> vector<32x256xf32>
    %c0_10 = arith.constant 0 : index
    %c0_11 = arith.constant 0 : index
    %36 = vector.load %arg4[%c0_10, %c0_11] : memref<9x256xf32, #tpu.memory_space<vmem>>, vector<1x256xf32>
    %37 = vector.broadcast %36 : vector<1x256xf32> to vector<32x256xf32>
    %38 = arith.mulf %35, %37 : vector<32x256xf32>
    %39 = arith.truncf %38 : vector<32x256xf32> to vector<32x256xbf16>
    %c0_12 = arith.constant 0 : index
    %c0_13 = arith.constant 0 : index
    %40 = vector.load %arg6[%c0_12, %c0_13] : memref<288x256xbf16, #tpu.memory_space<vmem>>, vector<32x256xbf16>
    tpu.vector_store %arg6[%c0_12, %c0_13], %39 {strides = array<i32>} : memref<288x256xbf16, #tpu.memory_space<vmem>>, vector<32x256xbf16>,
    %c16_i32 = arith.constant 16 : i32
    %41 = tpu.dynamic_rotate %34 by %c16_i32 dim 1 : vector<32x256xf32>, i32 -> vector<32x256xf32>
    %c1_14 = arith.constant 1 : index
    %c0_15 = arith.constant 0 : index
    %42 = vector.load %arg4[%c1_14, %c0_15] : memref<9x256xf32, #tpu.memory_space<vmem>>, vector<1x256xf32>
    %43 = vector.broadcast %42 : vector<1x256xf32> to vector<32x256xf32>
    %44 = arith.mulf %41, %43 : vector<32x256xf32>
    %45 = arith.truncf %44 : vector<32x256xf32> to vector<32x256xbf16>
    %c32 = arith.constant 32 : index
    %c0_16 = arith.constant 0 : index
    %46 = vector.load %arg6[%c32, %c0_16] : memref<288x256xbf16, #tpu.memory_space<vmem>>, vector<32x256xbf16>
    tpu.vector_store %arg6[%c32, %c0_16], %45 {strides = array<i32>} : memref<288x256xbf16, #tpu.memory_space<vmem>>, vector<32x256xbf16>,
    %c15_i32 = arith.constant 15 : i32
    %47 = tpu.dynamic_rotate %34 by %c15_i32 dim 1 : vector<32x256xf32>, i32 -> vector<32x256xf32>
    %c2_17 = arith.constant 2 : index
    %c0_18 = arith.constant 0 : index
    %48 = vector.load %arg4[%c2_17, %c0_18] : memref<9x256xf32, #tpu.memory_space<vmem>>, vector<1x256xf32>
    %49 = vector.broadcast %48 : vector<1x256xf32> to vector<32x256xf32>
    %50 = arith.mulf %47, %49 : vector<32x256xf32>
    %51 = arith.truncf %50 : vector<32x256xf32> to vector<32x256xbf16>
    %c64 = arith.constant 64 : index
    %c0_19 = arith.constant 0 : index
    %52 = vector.load %arg6[%c64, %c0_19] : memref<288x256xbf16, #tpu.memory_space<vmem>>, vector<32x256xbf16>
    tpu.vector_store %arg6[%c64, %c0_19], %51 {strides = array<i32>} : memref<288x256xbf16, #tpu.memory_space<vmem>>, vector<32x256xbf16>,
    %c1_i32 = arith.constant 1 : i32
    %53 = tpu.dynamic_rotate %34 by %c1_i32 dim 1 : vector<32x256xf32>, i32 -> vector<32x256xf32>
    %c3_20 = arith.constant 3 : index
    %c0_21 = arith.constant 0 : index
    %54 = vector.load %arg4[%c3_20, %c0_21] : memref<9x256xf32, #tpu.memory_space<vmem>>, vector<1x256xf32>
    %55 = vector.broadcast %54 : vector<1x256xf32> to vector<32x256xf32>
    %56 = arith.mulf %53, %55 : vector<32x256xf32>
    %57 = arith.truncf %56 : vector<32x256xf32> to vector<32x256xbf16>
    %c96 = arith.constant 96 : index
    %c0_22 = arith.constant 0 : index
    %58 = vector.load %arg6[%c96, %c0_22] : memref<288x256xbf16, #tpu.memory_space<vmem>>, vector<32x256xbf16>
    tpu.vector_store %arg6[%c96, %c0_22], %57 {strides = array<i32>} : memref<288x256xbf16, #tpu.memory_space<vmem>>, vector<32x256xbf16>,
    %59 = arith.truncf %34 : vector<32x256xf32> to vector<32x256xbf16>
    %c128 = arith.constant 128 : index
    %c0_23 = arith.constant 0 : index
    %60 = vector.load %arg6[%c128, %c0_23] : memref<288x256xbf16, #tpu.memory_space<vmem>>, vector<32x256xbf16>
    tpu.vector_store %arg6[%c128, %c0_23], %59 {strides = array<i32>} : memref<288x256xbf16, #tpu.memory_space<vmem>>, vector<32x256xbf16>,
    %c255_i32 = arith.constant 255 : i32
    %61 = tpu.dynamic_rotate %34 by %c255_i32 dim 1 : vector<32x256xf32>, i32 -> vector<32x256xf32>
    %c5 = arith.constant 5 : index
    %c0_24 = arith.constant 0 : index
    %62 = vector.load %arg4[%c5, %c0_24] : memref<9x256xf32, #tpu.memory_space<vmem>>, vector<1x256xf32>
    %63 = vector.broadcast %62 : vector<1x256xf32> to vector<32x256xf32>
    %64 = arith.mulf %61, %63 : vector<32x256xf32>
    %65 = arith.truncf %64 : vector<32x256xf32> to vector<32x256xbf16>
    %c160 = arith.constant 160 : index
    %c0_25 = arith.constant 0 : index
    %66 = vector.load %arg6[%c160, %c0_25] : memref<288x256xbf16, #tpu.memory_space<vmem>>, vector<32x256xbf16>
    tpu.vector_store %arg6[%c160, %c0_25], %65 {strides = array<i32>} : memref<288x256xbf16, #tpu.memory_space<vmem>>, vector<32x256xbf16>,
    %c241_i32 = arith.constant 241 : i32
    %67 = tpu.dynamic_rotate %34 by %c241_i32 dim 1 : vector<32x256xf32>, i32 -> vector<32x256xf32>
    %c6 = arith.constant 6 : index
    %c0_26 = arith.constant 0 : index
    %68 = vector.load %arg4[%c6, %c0_26] : memref<9x256xf32, #tpu.memory_space<vmem>>, vector<1x256xf32>
    %69 = vector.broadcast %68 : vector<1x256xf32> to vector<32x256xf32>
    %70 = arith.mulf %67, %69 : vector<32x256xf32>
    %71 = arith.truncf %70 : vector<32x256xf32> to vector<32x256xbf16>
    %c192 = arith.constant 192 : index
    %c0_27 = arith.constant 0 : index
    %72 = vector.load %arg6[%c192, %c0_27] : memref<288x256xbf16, #tpu.memory_space<vmem>>, vector<32x256xbf16>
    tpu.vector_store %arg6[%c192, %c0_27], %71 {strides = array<i32>} : memref<288x256xbf16, #tpu.memory_space<vmem>>, vector<32x256xbf16>,
    %c240_i32 = arith.constant 240 : i32
    %73 = tpu.dynamic_rotate %34 by %c240_i32 dim 1 : vector<32x256xf32>, i32 -> vector<32x256xf32>
    %c7 = arith.constant 7 : index
    %c0_28 = arith.constant 0 : index
    %74 = vector.load %arg4[%c7, %c0_28] : memref<9x256xf32, #tpu.memory_space<vmem>>, vector<1x256xf32>
    %75 = vector.broadcast %74 : vector<1x256xf32> to vector<32x256xf32>
    %76 = arith.mulf %73, %75 : vector<32x256xf32>
    %77 = arith.truncf %76 : vector<32x256xf32> to vector<32x256xbf16>
    %c224 = arith.constant 224 : index
    %c0_29 = arith.constant 0 : index
    %78 = vector.load %arg6[%c224, %c0_29] : memref<288x256xbf16, #tpu.memory_space<vmem>>, vector<32x256xbf16>
    tpu.vector_store %arg6[%c224, %c0_29], %77 {strides = array<i32>} : memref<288x256xbf16, #tpu.memory_space<vmem>>, vector<32x256xbf16>,
    %c239_i32 = arith.constant 239 : i32
    %79 = tpu.dynamic_rotate %34 by %c239_i32 dim 1 : vector<32x256xf32>, i32 -> vector<32x256xf32>
    %c8 = arith.constant 8 : index
    %c0_30 = arith.constant 0 : index
    %80 = vector.load %arg4[%c8, %c0_30] : memref<9x256xf32, #tpu.memory_space<vmem>>, vector<1x256xf32>
    %81 = vector.broadcast %80 : vector<1x256xf32> to vector<32x256xf32>
    %82 = arith.mulf %79, %81 : vector<32x256xf32>
    %83 = arith.truncf %82 : vector<32x256xf32> to vector<32x256xbf16>
    %c256 = arith.constant 256 : index
    %c0_31 = arith.constant 0 : index
    %84 = vector.load %arg6[%c256, %c0_31] : memref<288x256xbf16, #tpu.memory_space<vmem>>, vector<32x256xbf16>
    tpu.vector_store %arg6[%c256, %c0_31], %83 {strides = array<i32>} : memref<288x256xbf16, #tpu.memory_space<vmem>>, vector<32x256xbf16>,
    %c0_32 = arith.constant 0 : index
    %c0_33 = arith.constant 0 : index
    %85 = vector.load %arg3[%c0_32, %c0_33] : memref<32x288xbf16, #tpu.memory_space<vmem>>, vector<32x288xbf16>
    %c0_34 = arith.constant 0 : index
    %c0_35 = arith.constant 0 : index
    %86 = vector.load %arg6[%c0_34, %c0_35] : memref<288x256xbf16, #tpu.memory_space<vmem>>, vector<288x256xbf16>
    %cst_36 = arith.constant dense<0.000000e+00> : vector<32x256xf32>
    %87 = tpu.matmul %85, %86, %cst_36 {dimension_numbers = #tpu.dot_dimension_numbers<[1], [0], [0], [1], [0, 0, 1, 1], [], []>} : vector<32x288xbf16>, vector<288x256xbf16>, vector<32x256xf32> -> vector<32x256xf32>
    %c0_37 = arith.constant 0 : index
    %c5_38 = arith.constant 5 : index
    %88 = vector.load %arg2[%c0_37, %c5_38] : memref<32x6xf32, #tpu.memory_space<vmem>>, vector<32x1xf32>
    %89 = vector.broadcast %88 : vector<32x1xf32> to vector<32x256xf32>
    %90 = arith.addf %87, %89 : vector<32x256xf32>
    %cst_39 = arith.constant 0.000000e+00 : f32
    %91 = vector.broadcast %cst_39 : f32 to vector<32x256xf32>
    %92 = arith.cmpf oge, %90, %91 : vector<32x256xf32>
    %cst_40 = arith.constant 2.000000e-01 : f32
    %93 = vector.broadcast %cst_40 : f32 to vector<32x256xf32>
    %94 = arith.mulf %90, %93 : vector<32x256xf32>
    %95 = arith.select %92, %90, %94 : vector<32x256xi1>, vector<32x256xf32>
    %c0_41 = arith.constant 0 : index
    %c0_42 = arith.constant 0 : index
    %c0_43 = arith.constant 0 : index
    %96 = vector.load %arg5[%c0_41, %c0_42, %c0_43] : memref<1x32x256xf32, #tpu.memory_space<vmem>>, vector<1x32x256xf32>
    %97 = vector.shape_cast %96 : vector<1x32x256xf32> to vector<32x256xf32>
    %98 = vector.shape_cast %95 : vector<32x256xf32> to vector<1x32x256xf32>
    tpu.vector_store %arg5[%c0_41, %c0_42, %c0_43], %98 {strides = array<i32>} : memref<1x32x256xf32, #tpu.memory_space<vmem>>, vector<1x32x256xf32>,
    return
  }
  func.func @transform_0(%arg0: i32) -> (i32, i32, i32) {
    %c0_i32 = arith.constant 0 : i32
    %c0_i32_0 = arith.constant 0 : i32
    %c0_i32_1 = arith.constant 0 : i32
    return %arg0, %c0_i32, %c0_i32_0 : i32, i32, i32
  }
  func.func @transform_1(%arg0: i32) -> (i32, i32) {
    %c0_i32 = arith.constant 0 : i32
    %c0_i32_0 = arith.constant 0 : i32
    %c0_i32_1 = arith.constant 0 : i32
    return %c0_i32, %c0_i32_0 : i32, i32
  }
  func.func @transform_2(%arg0: i32) -> (i32, i32) {
    %c0_i32 = arith.constant 0 : i32
    %c0_i32_0 = arith.constant 0 : i32
    %c0_i32_1 = arith.constant 0 : i32
    return %c0_i32, %c0_i32_0 : i32, i32
  }
  func.func @transform_3(%arg0: i32) -> (i32, i32) {
    %c0_i32 = arith.constant 0 : i32
    %c0_i32_0 = arith.constant 0 : i32
    %c0_i32_1 = arith.constant 0 : i32
    return %c0_i32, %c0_i32_0 : i32, i32
  }
  func.func @transform_4(%arg0: i32) -> (i32, i32, i32) {
    %c0_i32 = arith.constant 0 : i32
    %c0_i32_0 = arith.constant 0 : i32
    %c0_i32_1 = arith.constant 0 : i32
    return %arg0, %c0_i32, %c0_i32_0 : i32, i32, i32
  }
}

</mosaic_0001>

<bundles_post_ra>
// kernel: tpu_custom_call.1
= control target key start
LH: loop header
LB: loop body
LE: loop exit
PB: predicated region body
PF: predicated region fallthrough
CT: control target
= control target key end

     0   :  { %9 = vsyncpa [#allocation4], 0  ;;  %s2018_s0 = inlined_call_operand.vmem [shape: f32[2,4,256], index: 0, kind: input, shape index: {}]   ;;  %s2019_s1 = inlined_call_operand.vmem [shape: f32[32,6], index: 1, kind: input, shape index: {}]   ;;  %s2020_s2 = inlined_call_operand.hbm [shape: bf16[32,288], index: 2, kind: input, shape index: {}]   ;;  %s2021_s3 = inlined_call_operand.vmem [shape: f32[9,256], index: 3, kind: input, shape index: {}]   ;;  %s2022_s4 = inlined_call_operand.hbm [shape: f32[2,32,256], index: 4, kind: output, shape index: {}]  }
   0x1   :  { %10 = vsyncpa [#allocation5], 0 }
   0x2   :  { %12 = vsyncpa [#allocation5 + $0x1], 0  ;;  %s1518_s15 = smov 0   ;;  %s1520_s16 = smov 0  }
   0x3   :  { %s1522_s17 = smov 0   ;;  %s1524_s18 = smov 0  }
   0x4 LB: > { %s1539_s19 = sadd.s32 4294967295, %s1472_s18   ;;  %s1242_s20 = sadd.s32 4294967294, %s1472_s18   ;;  %s1472_s18 = sphi %s1524_s18, %s2038_s18   ;;  %s1468_s17 = sphi %s1522_s17, %s2037_s17   ;;  %s1464_s16 = sphi %s1520_s16, %s2036_s16   ;;  %s1460_s15 = sphi %s1518_s15, %s2035_s15  }
   0x5   : > { %s1543_s21 = sadd.s32 1, %s1472_s18   ;;  %s114_s22 = sadd.s32 1, %s1468_s17 }
   0x6   : > { %s111_s23 = ssub.s32 %s1472_s18, %s1543_s21  ;;  %p124_p0 = scmp.ne.s32.totalorder %s1468_s17, %s1464_s16 }
   0x7   : > { %p112_p1 = scmp.eq.s32.totalorder %s111_s23, 0  ;;  %p125_p2 = scmp.eq.s32.totalorder %s1539_s19, 1 }
   0x8   : > { %p130_p3 = scmp.ne.s32.totalorder %s1464_s16, %s1460_s15  ;;  %p131_p4 = scmp.eq.s32.totalorder %s1242_s20, 1 }
   0x9   : > { %s1554_s24 = scalar_select %p112_p1, %s1468_s17, %s114_s22  }
   0xa   : > { %p1556_p5 = por %p125_p2, %p124_p0  ;;  %p1560_p6 = por %p131_p4, %p130_p3 }
   0xb   : > { %p1243_p7 = scmp.ge.s32.totalorder %s1472_s18, 1  ;;  %p138_p8 = scmp.lt.s32.totalorder %s1472_s18, 3 }
   0xc   : > { %s2026_s25 = scalar_select %p1556_p5, 1, 0 }
   0xd   : > { %s2027_s26 = scalar_select %p1560_p6, 1, 0 }
   0xe   : > { %p2023_p9 = scmp.eq.s32.totalorder %s1539_s19, 0  ;;  %p1567_p10 = pnand %p1243_p7, %p138_p8 }
   0xf   : > { %s1474_s28 = smov [#allocation3]   ;;  %s1378_s7 = scalar_lea.hbm %s2020_s2, 768 }
  0x10   : > { %s2028_s27 = scalar_select %p1567_p10, 1, 0 }
  0x11   : > { %s153_s29 = sshll.u32 %s1474_s28, 4  ;;  %p1295_p11 = pneg %p1567_p10  ;;  %s154_s29 = int_to_ptr.vmem [resolvable:$true] %s153_s29 }
  0x12   : > { %p1379_p13 = scmp.ne.s32.totalorder %s2020_s2, %s1378_s7  ;;  %p1385_p3 = scmp.lt.u32.totalorder %s1378_s7, %s2020_s2 }
  0x13   : > { %p1575_p12 = pnand %p2023_p9, %p1295_p11 }
  0x15   : > { %p1380_p0 = pneg %p1575_p12 }
  0x17   : > { %p1381_p1 = pnand %p1380_p0, %p1379_p13 }
  0x19   : > { %p1382_p2 = pneg %p1381_p1 }
  0x1b   : > { %p1387_p4 = pnand %p1385_p3, %p1382_p2 }
  0x1d   : > { %1390 = shalt.err (!%p1387_p4)
}
  0x1e   : > { %s1391_s12 = scalar_lea.vmem %s154_s29, 768  ;;  %p1399_p9 = scmp.lt.s32.totalorder %s154_s29, %s154_s29 }
  0x1f   : > { %p1392_p7 = scmp.ne.s32.totalorder %s154_s29, %s1391_s12  ;;  %p1400_p6 = scmp.lt.s32.totalorder %s1391_s12, %s1391_s12 }
  0x21   : > { %p1394_p8 = pnand %p1392_p7, %p1380_p0  ;;  %p1401_p5 = por %p1400_p6, %p1399_p9 }
  0x23   : > { %p1395_p11 = pneg %p1394_p8 }
  0x25   : > { %p1402_p10 = pnand %p1401_p5, %p1395_p11 }
  0x27   : > { %1405 = shalt.err (!%p1402_p10)
}
  0x28   : > { %s1475_s13 = smov 192   ;;  %s1476_s14 = smov 12  }
  0x29   : > { %1298 = dma.hbm_to_vmem [thread:$0]  (!%p1575_p12), %s2020_s2, 768, %s154_s29, [#allocation4], %s1475_s13, %s1475_s13, %s1476_s14  }
  0x2a   : > { %p2030_p13 = scmp.ne.s32.totalorder %s2028_s27, 0 }
  0x2b   : > { %p2031_p1 = scmp.eq.s32.totalorder (!%p2030_p13), %s1539_s19, 0 }
  0x2c   : > { %180 = sbr.rel (%p2030_p13) target bundleno = 725 (0x2d5), region = 36 }
  0x33   : > { %1451 = dma.done.wait (%p2031_p1), [#allocation4], 768   ;;  %p2032_p0 = pmov %p2031_p1 }
  0x34   : > { %v1477_v0 = vmov 1   ;;  %v1478_v1 = vmov 0   ;;  %v213_v2 = vld [vmem:[%s2019_s1] sm:$0xff]  ;;  %v214_v3 = vld [vmem:[%s2019_s1 + $0x8] sm:$0xff]  ;;  %v216_v4 = vld [vmem:[%s2019_s1 + $0x18] sm:$0xff]  ;;  %v1479_v5 = vmov 2   ;;  %v238_v9 = vlaneseq }
  0x35   : > { %1453 = vsyncadd (%p2032_p0), [#allocation4], 4294966528  ;;  %1357 = vset.pattern.permute.xlu1 %v1477_v0  ;;  %1356 = vset.pattern.permute.xlu0 %v1478_v1  ;;  %v215_v6 = vld [vmem:[%s2019_s1 + $0x10] sm:$0xff]  ;;  %v1480_v7 = vmov 3   ;;  %v1481_v8 = vmov 4   ;;  %p206_p5 = scmp.lt.s32.totalorder %s1539_s19, 1 }
  0x36   : > { %1101 = vmatprep.mubr.bf16.mxu0 %v1478_v1  ;;  %273 = vperm.xlu1 %1357, %v213_v2   ;;  %v239_v10 = vshrl.u32 %v238_v9, 7  ;;  %s1482_s13 = smov 17   ;;  %s1483_s14 = smov 16  }
  0x37   : > { %219 = vperm.xlu0 %1356, %v213_v2   ;;  %s207_s8 = scalar_select %p206_p5, %s1539_s19, 1 }
  0x38   : > { %v1622_v13 = vsub.s32 1, %v239_v10  ;;  %v294_v14 = vsub.s32 5, %v239_v10  ;;  %v1624_v15 = vsub.s32 0, %v239_v10  ;;  %v244_v16 = vsub.s32 4, %v239_v10  ;;  %s1484_s20 = smov 15   ;;  %s1485_s22 = smov 1  }
  0x39   : > { %s1271_s9 = sshll.u32 %s207_s8, 3  ;;  %v340_v25 = vsub.s32 2, %v239_v10  ;;  %v344_v26 = vsub.s32 6, %v239_v10  ;;  %v390_v28 = vsub.s32 3, %v239_v10  ;;  %v394_v29 = vsub.s32 7, %v239_v10  ;;  %s1486_s23 = smov 127  }
  0x3a   : > { %277 = vperm.xlu1 %1357, %v214_v3   ;;  %s210_s12 = scalar_lea.vmem %s2018_s0, %s1271_s9  ;;  %s1487_s28 = smov 113  }
  0x3b   : > { %224 = vperm.xlu0 %1356, %v214_v3   ;;  %v212_v19 = vld [vmem:[%s210_s12] sm:$0xff]  ;;  %s1488_s27 = smov 112   ;;  %s1489_s29 = smov 111  }
  0x3c   : > { %v291_v20 = vrot.slane %v212_v19, %v1622_v13  ;;  %v295_v21 = vrot.slane %v212_v19, %v294_v14  ;;  %v241_v22 = vrot.slane %v212_v19, %v1624_v15  ;;  %v245_v23 = vrot.slane %v212_v19, %v244_v16  ;;  %s203_s12 = sand.u32 1, %s1464_s16   ;;  %p2033_p9 = scmp.ne.s32.totalorder %s2026_s25, 0 }
  0x3d   : > { %v341_v34 = vrot.slane %v212_v19, %v340_v25  ;;  %v345_v35 = vrot.slane %v212_v19, %v344_v26  ;;  %v391_v38 = vrot.slane %v212_v19, %v390_v28  ;;  %v395_v39 = vrot.slane %v212_v19, %v394_v29  ;;  %s1491_s5 = smov [#allocation6]  }
  0x3e   : > { %1358 = vset.pattern.permute.xlu1 %v1479_v5  ;;  %v301_v30 = vrot.slane %v291_v20, %v1622_v13  ;;  %v305_v31 = vrot.slane %v295_v21, %v1622_v13  ;;  %v251_v32 = vrot.slane %v241_v22, %v1624_v15  ;;  %v1634_v33 = vrot.slane %v245_v23, %v1624_v15  ;;  %s1410_s6 = sshll.u32 %s1491_s5, 4  ;;  %s1411_s6 = int_to_ptr.vmem [resolvable:$false] %s1410_s6 }
  0x3f   : > { %234 = vperm.xlu0 %1356, %v216_v4   ;;  %327 = vperm.xlu1 %1358, %v214_v3   ;;  %v351_v44 = vrot.slane %v341_v34, %v340_v25  ;;  %v355_v45 = vrot.slane %v345_v35, %v340_v25  ;;  %v401_v46 = vrot.slane %v391_v38, %v390_v28  ;;  %s1412_s7 = scalar_lea.vmem %s1411_s6, 2048 }
  0x40   : > { %v1637_v47 = vrot.slane %v395_v39, %v390_v28 }
  0x43   : > { %1361 = vset.pattern.permute.xlu0 %v1480_v7  ;;  %1359 = vset.pattern.permute.xlu1 %v1478_v1 }
  0x44   : > { %373 = vperm.xlu0 %1361, %v213_v2   ;;  %229 = vperm.xlu1 %1359, %v215_v6  }
  0x48   : > { %1362 = vset.pattern.permute.xlu0 %v1479_v5  ;;  %1360 = vset.pattern.permute.xlu1 %v1477_v0 }
  0x49   : > { %323 = vperm.xlu0 %1362, %v213_v2   ;;  %281 = vperm.xlu1 %1360, %v215_v6  }
  0x4d   : > { %335 = vperm.xlu0 %1362, %v216_v4   ;;  %285 = vperm.xlu1 %1360, %v216_v4  }
  0x51   : > { %1366 = vset.pattern.permute.xlu0 %v1481_v8  ;;  %1363 = vset.pattern.permute.xlu1 %v1480_v7 }
  0x52   : > { %423 = vperm.xlu0 %1366, %v213_v2   ;;  %377 = vperm.xlu1 %1363, %v214_v3  }
  0x56   : > { %435 = vperm.xlu0 %1366, %v216_v4   ;;  %1364 = vset.pattern.permute.xlu1 %v1479_v5 }
  0x57   : > { %331 = vperm.xlu1 %1364, %v215_v6  }
  0x5b   : > { %1365 = vset.pattern.permute.xlu1 %v1480_v7 }
  0x5c   : > { %381 = vperm.xlu1 %1365, %v215_v6  }
  0x60   : > { %385 = vperm.xlu1 %1365, %v216_v4  }
  0x64   : > { %1367 = vset.pattern.permute.xlu1 %v1481_v8 }
  0x65   : > { %427 = vperm.xlu1 %1367, %v214_v3  }
  0x69   : > { %431 = vperm.xlu1 %1367, %v215_v6  }
  0xb5   : > { %v274_v11 = vpop.permute.xlu1 %273 }
  0xb6   : > { %v220_v12 = vpop.permute.xlu0 %219  ;;  %v306_v40 = vmul.f32 %v301_v30, %v274_v11  ;;  %v307_v41 = vmul.f32 %v305_v31, %v274_v11 }
  0xb7   : > { %v256_v42 = vmul.f32 %v251_v32, %v220_v12  ;;  %v257_v43 = vmul.f32 %v1634_v33, %v220_v12 }
  0xb9   : > { %v278_v17 = vpop.permute.xlu1 %277  ;;  %v314_v52 = vadd.f32 %v306_v40, %v256_v42  ;;  %v315_v53 = vadd.f32 %v307_v41, %v257_v43 }
  0xba   : > { %v225_v18 = vpop.permute.xlu0 %224  ;;  %v308_v7 = vmul.f32 %v301_v30, %v278_v17  ;;  %v309_v12 = vmul.f32 %v305_v31, %v278_v17 }
  0xbb   : > { %v258_v8 = vmul.f32 %v251_v32, %v225_v18  ;;  %v259_v14 = vmul.f32 %v1634_v33, %v225_v18 }
  0xbd   : > { %v316_v21 = vadd.f32 %v308_v7, %v258_v8  ;;  %v317_v34 = vadd.f32 %v309_v12, %v259_v14 }
  0xbe   : > { %v1628_v24 = vpop.permute.xlu0 %234  ;;  %v328_v27 = vpop.permute.xlu1 %327 }
  0xbf   : > { %v358_v19 = vmul.f32 %v351_v44, %v328_v27  ;;  %v262_v20 = vmul.f32 %v251_v32, %v1628_v24  ;;  %v359_v22 = vmul.f32 %v355_v45, %v328_v27  ;;  %v263_v18 = vmul.f32 %v1634_v33, %v1628_v24 }
  0xc1   : > { %v366_v17 = vadd.f32 %v358_v19, %v316_v21  ;;  %v367_v42 = vadd.f32 %v359_v22, %v317_v34  ;;  %v1742_v21 = vand.u32 127, %v238_v9  ;;  %v1372_v22 = vld [vmem:[#allocation3 + $0x4] ss:$12 sps:$4 sm:$0xff]  }
  0xc2   : > { %1048 = vmatprep.mubr.bf16.mxu1 %v1372_v22 }
  0xc3   : > { %v374_v36 = vpop.permute.xlu0 %373  ;;  %v230_v37 = vpop.permute.xlu1 %229  ;;  %vm488_vm8 = vcmp.lt.s32.totalorder %v1742_v21, 17  ;;  %vm541_vm9 = vcmp.lt.s32.totalorder %v1742_v21, 16  ;;  %vm595_vm10 = vcmp.lt.s32.totalorder %v1742_v21, 15  ;;  %vm649_vm11 = vcmp.lt.s32.totalorder %v1742_v21, 1 }
  0xc4   : > { %v406_v54 = vmul.f32 %v401_v46, %v374_v36  ;;  %v407_v55 = vmul.f32 %v1637_v47, %v374_v36  ;;  %v260_v35 = vmul.f32 %v251_v32, %v230_v37  ;;  %v261_v40 = vmul.f32 %v1634_v33, %v230_v37 }
  0xc5   : > { %vm711_vm12 = vcmp.lt.s32.totalorder %v1742_v21, 127  ;;  %vm765_vm13 = vcmp.lt.s32.totalorder %v1742_v21, 113  ;;  %vm819_vm14 = vcmp.lt.s32.totalorder %v1742_v21, 112  ;;  %vm873_vm15 = vcmp.lt.s32.totalorder %v1742_v21, 111  ;;  %v1377_v21 = vld [vmem:[#allocation3 + $0x20] ss:$12 sps:$4 sm:$0xff]  }
  0xc8   : > { %v324_v48 = vpop.permute.xlu0 %323  ;;  %v282_v51 = vpop.permute.xlu1 %281 }
  0xc9   : > { %v356_v49 = vmul.f32 %v351_v44, %v324_v48  ;;  %v357_v50 = vmul.f32 %v355_v45, %v324_v48  ;;  %v310_v23 = vmul.f32 %v301_v30, %v282_v51  ;;  %v311_v25 = vmul.f32 %v305_v31, %v282_v51 }
  0xcb   : > { %v364_v56 = vadd.f32 %v356_v49, %v314_v52  ;;  %v365_v57 = vadd.f32 %v357_v50, %v315_v53  ;;  %v318_v27 = vadd.f32 %v310_v23, %v260_v35  ;;  %v497_v23 = vld [vmem:[%s2021_s3] ss:$8 sm:$0x3] }
  0xcc   : > { %v336_v58 = vpop.permute.xlu0 %335  ;;  %v286_v59 = vpop.permute.xlu1 %285 }
  0xcd   : > { %v414_v60 = vadd.f32 %v406_v54, %v364_v56  ;;  %v415_v61 = vadd.f32 %v407_v55, %v365_v57  ;;  %v312_v11 = vmul.f32 %v301_v30, %v286_v59  ;;  %v313_v26 = vmul.f32 %v305_v31, %v286_v59 }
  0xce   : > { %v362_v29 = vmul.f32 %v351_v44, %v336_v58  ;;  %v319_v31 = vadd.f32 %v311_v25, %v261_v40  ;;  %v363_v49 = vmul.f32 %v355_v45, %v336_v58 }
  0xcf   : > { %v320_v28 = vadd.f32 %v312_v11, %v262_v20  ;;  %v321_v48 = vadd.f32 %v313_v26, %v263_v18 }
  0xd1   : > { %v424_v62 = vpop.permute.xlu0 %423  ;;  %v378_v2 = vpop.permute.xlu1 %377  ;;  %v370_v50 = vadd.f32 %v362_v29, %v320_v28  ;;  %v502_v28 = vrot.slane %v497_v23, %v1624_v15  ;;  %v506_v29 = vrot.slane %v497_v23, %v1622_v13 }
  0xd2   : > { %v438_v63 = vadd.f32 %v424_v62, %v414_v60  ;;  %v439_v0 = vadd.f32 %v424_v62, %v415_v61  ;;  %v408_v36 = vmul.f32 %v401_v46, %v378_v2  ;;  %v409_v38 = vmul.f32 %v1637_v47, %v378_v2 }
  0xd4   : > { %vm446_vm0 = vcmp.ge.f32.partialorder %v438_v63, 0.0  ;;  %v454_v3 = vmul.f32 0.2, %v438_v63  ;;  %v455_v4 = vmul.f32 0.2, %v439_v0  ;;  %vm447_vm1 = vcmp.ge.f32.partialorder %v439_v0, 0.0 }
  0xd5   : > { %v416_v52 = vadd.f32 %v408_v36, %v366_v17  ;;  %v417_v53 = vadd.f32 %v409_v38, %v367_v42  ;;  %v436_v37 = vpop.permute.xlu0 %435 }
  0xd6   : > { %v1640_v5 = vsel %vm446_vm0, %v438_v63, %v454_v3  ;;  %v332_v6 = vpop.permute.xlu1 %331  ;;  %v1644_v10 = vsel %vm447_vm1, %v439_v0, %v455_v4  ;;  %vm1009_vm0 = vcmask 261120  }
  0xd7   : > { %470 = vrot.lane.b32.xlu1 %v1640_v5, %s1482_s13  ;;  %v360_v30 = vmul.f32 %v351_v44, %v332_v6  ;;  %v361_v43 = vmul.f32 %v355_v45, %v332_v6  ;;  %v371_v44 = vadd.f32 %v363_v49, %v321_v48 }
  0xd9   : > { %v368_v56 = vadd.f32 %v360_v30, %v318_v27  ;;  %v369_v33 = vadd.f32 %v361_v43, %v319_v31 }
  0xdb   : > { %478 = vrot.lane.b32.xlu1 %v1644_v10, %s1482_s13  ;;  %v382_v16 = vpop.permute.xlu1 %381 }
  0xdc   : > { %v410_v32 = vmul.f32 %v401_v46, %v382_v16  ;;  %v411_v51 = vmul.f32 %v1637_v47, %v382_v16 }
  0xde   : > { %v418_v61 = vadd.f32 %v410_v32, %v368_v56  ;;  %v419_v45 = vadd.f32 %v411_v51, %v369_v33  ;;  %v956_v56 = vld [vmem:[%s2019_s1 + $0x8] sm:$0xff] }
  0xdf   : > { %v386_v39 = vpop.permute.xlu1 %385  ;;  %v1251_v33 = vld [vmem:[%s2021_s3 + $0x1] ss:$8 sm:$0x3] }
  0xe0   : > { %v412_v41 = vmul.f32 %v401_v46, %v386_v39  ;;  %v413_v54 = vmul.f32 %v1637_v47, %v386_v39 }
  0xe2   : > { %v420_v55 = vadd.f32 %v412_v41, %v370_v50  ;;  %v421_v58 = vadd.f32 %v413_v54, %v371_v44 }
  0xe4   : > { %v428_v24 = vpop.permute.xlu1 %427  ;;  %v444_v46 = vadd.f32 %v436_v37, %v420_v55  ;;  %v445_v4 = vadd.f32 %v436_v37, %v421_v58  ;;  %v1490_v37 = vmov 5   ;;  %v560_v58 = vrot.slane %v1251_v33, %v1622_v13 }
  0xe5   : > { %v440_v57 = vadd.f32 %v428_v24, %v416_v52  ;;  %v441_v59 = vadd.f32 %v428_v24, %v417_v53  ;;  %v955_v24 = vld [vmem:[%s2019_s1] sm:$0xff]  ;;  %1368 = vset.pattern.permute.xlu1 %v1490_v37  ;;  %1369 = vset.pattern.permute.xlu0 %v1490_v37 }
  0xe6   : > { %v460_v6 = vmul.f32 0.2, %v444_v46  ;;  %vm452_vm5 = vcmp.ge.f32.partialorder %v444_v46, 0.0  ;;  %v461_v12 = vmul.f32 0.2, %v445_v4  ;;  %vm453_vm7 = vcmp.ge.f32.partialorder %v445_v4, 0.0 }
  0xe7   : > { %vm448_vm2 = vcmp.ge.f32.partialorder %v440_v57, 0.0  ;;  %v456_v60 = vmul.f32 0.2, %v440_v57  ;;  %v457_v63 = vmul.f32 0.2, %v441_v59  ;;  %vm449_vm3 = vcmp.ge.f32.partialorder %v441_v59, 0.0 }
  0xe8   : > { %v432_v62 = vpop.permute.xlu1 %431  ;;  %v1668_v14 = vsel %vm452_vm5, %v444_v46, %v460_v6  ;;  %v1676_v19 = vsel %vm453_vm7, %v445_v4, %v461_v12  ;;  %v958_v4 = vld [vmem:[%s2019_s1 + $0x18] sm:$0xff] }
  0xe9   : > { %v1656_v0 = vsel %vm448_vm2, %v440_v57, %v456_v60  ;;  %v442_v2 = vadd.f32 %v432_v62, %v418_v61  ;;  %v443_v47 = vadd.f32 %v432_v62, %v419_v45  ;;  %v1660_v7 = vsel %vm449_vm3, %v441_v59, %v457_v63  ;;  %v957_v61 = vld [vmem:[%s2019_s1 + $0x10] sm:$0xff] }
  0xea   : > { %472 = vrot.lane.b32.xlu0 %v1656_v0, %s1482_s13  ;;  %v556_v45 = vrot.slane %v1251_v33, %v1624_v15 }
  0xeb   : > { %vm450_vm4 = vcmp.ge.f32.partialorder %v442_v2, 0.0  ;;  %v458_v3 = vmul.f32 0.2, %v442_v2  ;;  %v459_v8 = vmul.f32 0.2, %v443_v47  ;;  %vm451_vm6 = vcmp.ge.f32.partialorder %v443_v47, 0.0 }
  0xed   : > { %v1662_v11 = vsel %vm450_vm4, %v442_v2, %v458_v3  ;;  %v1670_v16 = vsel %vm451_vm6, %v443_v47, %v459_v8 }
  0xee   : > { %480 = vrot.lane.b32.xlu0 %v1660_v7, %s1482_s13  ;;  %474 = vrot.lane.b32.xlu1 %v1662_v11, %s1482_s13 }
  0xf2   : > { %476 = vrot.lane.b32.xlu0 %v1668_v14, %s1482_s13  ;;  %482 = vrot.lane.b32.xlu1 %v1670_v16, %s1482_s13 }
  0xf6   : > { %484 = vrot.lane.b32.xlu0 %v1676_v19, %s1482_s13  ;;  %525 = vrot.lane.b32.xlu1 %v1640_v5, %s1483_s14  ;;  %s1248_s13 = sshll.u32 %s203_s12, 6 }
  0xfa   : > { %527 = vrot.lane.b32.xlu0 %v1656_v0, %s1483_s14  ;;  %533 = vrot.lane.b32.xlu1 %v1644_v10, %s1483_s14 }
  0xfe   : > { %535 = vrot.lane.b32.xlu0 %v1660_v7, %s1483_s14  ;;  %529 = vrot.lane.b32.xlu1 %v1662_v11, %s1483_s14 }
 0x102   : > { %531 = vrot.lane.b32.xlu0 %v1668_v14, %s1483_s14  ;;  %537 = vrot.lane.b32.xlu1 %v1670_v16, %s1483_s14 }
 0x106   : > { %539 = vrot.lane.b32.xlu0 %v1676_v19, %s1483_s14  ;;  %579 = vrot.lane.b32.xlu1 %v1640_v5, %s1484_s20 }
 0x10a   : > { %581 = vrot.lane.b32.xlu0 %v1656_v0, %s1484_s20  ;;  %587 = vrot.lane.b32.xlu1 %v1644_v10, %s1484_s20 }
 0x10e   : > { %589 = vrot.lane.b32.xlu0 %v1660_v7, %s1484_s20  ;;  %583 = vrot.lane.b32.xlu1 %v1662_v11, %s1484_s20 }
 0x112   : > { %585 = vrot.lane.b32.xlu0 %v1668_v14, %s1484_s20  ;;  %591 = vrot.lane.b32.xlu1 %v1670_v16, %s1484_s20 }
 0x116   : > { %593 = vrot.lane.b32.xlu0 %v1676_v19, %s1484_s20  ;;  %633 = vrot.lane.b32.xlu1 %v1640_v5, %s1485_s22  ;;  %s1955_s20 = scalar_lea.vmem [#allocation6], %s1248_s13 }
 0x11a   : > { %635 = vrot.lane.b32.xlu0 %v1656_v0, %s1485_s22  ;;  %641 = vrot.lane.b32.xlu1 %v1644_v10, %s1485_s22 }
 0x11e   : > { %643 = vrot.lane.b32.xlu0 %v1660_v7, %s1485_s22  ;;  %637 = vrot.lane.b32.xlu1 %v1662_v11, %s1485_s22 }
 0x122   : > { %639 = vrot.lane.b32.xlu0 %v1668_v14, %s1485_s22  ;;  %645 = vrot.lane.b32.xlu1 %v1670_v16, %s1485_s22 }
 0x126   : > { %647 = vrot.lane.b32.xlu0 %v1676_v19, %s1485_s22  ;;  %695 = vrot.lane.b32.xlu1 %v1640_v5, %s1486_s23  ;;  %s1168_s22 = sshll.u32 %s1955_s20, 4  ;;  %s1963_s22 = int_to_ptr.vmem [resolvable:$true] %s1168_s22 }
 0x127   : > { %s1406_s30 = scalar_lea.vmem %s1963_s22, 1024  ;;  %p1413_p2 = scmp.lt.s32.totalorder %s1963_s22, %s1411_s6 }
 0x128   : > { %p1407_p6 = scmp.ne.s32.totalorder %s1963_s22, %s1406_s30  ;;  %p1414_p3 = scmp.lt.s32.totalorder %s1412_s7, %s1406_s30 }
 0x12a   : > { %697 = vrot.lane.b32.xlu0 %v1656_v0, %s1486_s23  ;;  %703 = vrot.lane.b32.xlu1 %v1644_v10, %s1486_s23  ;;  %p1408_p10 = pnand %p1407_p6, %p2033_p9  ;;  %p1415_p4 = por %p1414_p3, %p1413_p2 }
 0x12c   : > { %p1409_p12 = pneg %p1408_p10 }
 0x12e   : > { %705 = vrot.lane.b32.xlu0 %v1660_v7, %s1486_s23  ;;  %699 = vrot.lane.b32.xlu1 %v1662_v11, %s1486_s23  ;;  %p1416_p7 = pnand %p1415_p4, %p1409_p12 }
 0x132   : > { %701 = vrot.lane.b32.xlu0 %v1668_v14, %s1486_s23  ;;  %707 = vrot.lane.b32.xlu1 %v1670_v16, %s1486_s23 }
 0x136   : > { %709 = vrot.lane.b32.xlu0 %v1676_v19, %s1486_s23  ;;  %749 = vrot.lane.b32.xlu1 %v1640_v5, %s1487_s28  ;;  %s1272_s23 = sshll.u32 %s1539_s19, 10  ;;  %s1976_s19 = scalar_lea.sflag [#allocation5], %s203_s12 }
 0x13a   : > { %751 = vrot.lane.b32.xlu0 %v1656_v0, %s1487_s28  ;;  %757 = vrot.lane.b32.xlu1 %v1644_v10, %s1487_s28 }
 0x13e   : > { %759 = vrot.lane.b32.xlu0 %v1660_v7, %s1487_s28  ;;  %753 = vrot.lane.b32.xlu1 %v1662_v11, %s1487_s28 }
 0x142   : > { %755 = vrot.lane.b32.xlu0 %v1668_v14, %s1487_s28  ;;  %761 = vrot.lane.b32.xlu1 %v1670_v16, %s1487_s28 }
 0x146   : > { %763 = vrot.lane.b32.xlu0 %v1676_v19, %s1487_s28  ;;  %803 = vrot.lane.b32.xlu1 %v1640_v5, %s1488_s27 }
 0x149   : > { %v471_v20 = vpop.permute.xlu1 %470 }
 0x14a   : > { %805 = vrot.lane.b32.xlu0 %v1656_v0, %s1488_s27  ;;  %811 = vrot.lane.b32.xlu1 %v1644_v10, %s1488_s27 }
 0x14d   : > { %v479_v25 = vpop.permute.xlu1 %478 }
 0x14e   : > { %813 = vrot.lane.b32.xlu0 %v1660_v7, %s1488_s27  ;;  %857 = vrot.lane.b32.xlu1 %v1640_v5, %s1489_s29  ;;  %v493_v9 = vsel %vm488_vm8, %v479_v25, %v471_v20  ;;  %v489_v34 = vsel %vm488_vm8, %v471_v20, %v479_v25 }
 0x14f   : > { %v509_v38 = vmul.f32 %v502_v28, %v493_v9  ;;  %v510_v40 = vmul.f32 %v506_v29, %v489_v34 }
 0x152   : > { %859 = vrot.lane.b32.xlu0 %v1656_v0, %s1489_s29  ;;  %865 = vrot.lane.b32.xlu1 %v1644_v10, %s1489_s29 }
 0x156   : > { %867 = vrot.lane.b32.xlu0 %v1660_v7, %s1489_s29  ;;  %807 = vrot.lane.b32.xlu1 %v1662_v11, %s1488_s27 }
 0x15a   : > { %809 = vrot.lane.b32.xlu0 %v1668_v14, %s1488_s27  ;;  %815 = vrot.lane.b32.xlu1 %v1670_v16, %s1488_s27 }
 0x15c   : > { %v473_v26 = vpop.permute.xlu0 %472 }
 0x15e   : > { %817 = vrot.lane.b32.xlu0 %v1676_v19, %s1488_s27  ;;  %861 = vrot.lane.b32.xlu1 %v1662_v11, %s1489_s29 }
 0x160   : > { %v481_v35 = vpop.permute.xlu0 %480  ;;  %v475_v36 = vpop.permute.xlu1 %474 }
 0x161   : > { %v490_v39 = vsel %vm488_vm8, %v473_v26, %v481_v35  ;;  %v494_v17 = vsel %vm488_vm8, %v481_v35, %v473_v26 }
 0x162   : > { %v511_v18 = vmul.f32 %v502_v28, %v494_v17  ;;  %863 = vrot.lane.b32.xlu0 %v1668_v14, %s1489_s29  ;;  %869 = vrot.lane.b32.xlu1 %v1670_v16, %s1489_s29  ;;  %v512_v41 = vmul.f32 %v506_v29, %v490_v39 }
 0x164   : > { %v477_v42 = vpop.permute.xlu0 %476  ;;  %v483_v27 = vpop.permute.xlu1 %482  ;;  %v518_v30 = vpack.c.bf16 %v512_v41, %v510_v40  ;;  %v517_v43 = vpack.c.bf16 %v511_v18, %v509_v38  ;;  %v1252_v40 = vld [vmem:[%s2021_s3 + $0x2] ss:$8 sm:$0x3] }
 0x165   : > { %v495_v31 = vsel %vm488_vm8, %v483_v27, %v475_v36  ;;  %v491_v48 = vsel %vm488_vm8, %v475_v36, %v483_v27 }
 0x166   : > { %871 = vrot.lane.b32.xlu0 %v1676_v19, %s1489_s29  ;;  %1016 = vmatprep.subr.bf16.mxu1 %v518_v30  ;;  %v513_v32 = vmul.f32 %v502_v28, %v495_v31  ;;  %v514_v53 = vmul.f32 %v506_v29, %v491_v48  ;;  %v614_v31 = vrot.slane %v1252_v40, %v1622_v13  ;;  %s1970_s29 = scalar_lea.hbm %s2022_s4, %s1272_s23 }
 0x167   : > { %1017 = vmatpush1.bf16.msra.mxu1 %v517_v43  ;;  %961 = vperm.xlu1 %1368, %v955_v24   ;;  %v610_v43 = vrot.slane %v1252_v40, %v1624_v15 }
 0x168   : > { %v485_v49 = vpop.permute.xlu0 %484  ;;  %v526_v50 = vpop.permute.xlu1 %525 }
 0x169   : > { %v492_v51 = vsel %vm488_vm8, %v477_v42, %v485_v49  ;;  %v496_v52 = vsel %vm488_vm8, %v485_v49, %v477_v42 }
 0x16a   : > { %v515_v54 = vmul.f32 %v502_v28, %v496_v52  ;;  %v516_v55 = vmul.f32 %v506_v29, %v492_v51  ;;  %966 = vperm.xlu0 %1369, %v956_v56  }
 0x16b   : > { %971 = vperm.xlu1 %1368, %v957_v61  }
 0x16c   : > { %v528_v57 = vpop.permute.xlu0 %527  ;;  %v534_v59 = vpop.permute.xlu1 %533  ;;  %v520_v44 = vpack.c.bf16 %v516_v55, %v514_v53  ;;  %v519_v60 = vpack.c.bf16 %v515_v54, %v513_v32 }
 0x16d   : > { %v542_v46 = vsel %vm541_vm9, %v526_v50, %v534_v59  ;;  %v546_v62 = vsel %vm541_vm9, %v534_v59, %v526_v50 }
 0x16e   : > { %1018 = vmatprep.subr.bf16.mxu1 %v520_v44  ;;  %v563_v6 = vmul.f32 %v556_v45, %v546_v62  ;;  %v564_v8 = vmul.f32 %v560_v58, %v542_v46 }
 0x16f   : > { %1019 = vmatpush1.bf16.msra.mxu1 %v519_v60  ;;  %976 = vperm.xlu1 %1368, %v958_v4  }
 0x170   : > { %v536_v63 = vpop.permute.xlu0 %535  ;;  %v530_v2 = vpop.permute.xlu1 %529 }
 0x171   : > { %v543_v47 = vsel %vm541_vm9, %v528_v57, %v536_v63  ;;  %v547_v3 = vsel %vm541_vm9, %v536_v63, %v528_v57 }
 0x172   : > { %v565_v12 = vmul.f32 %v556_v45, %v547_v3  ;;  %v566_v20 = vmul.f32 %v560_v58, %v543_v47  ;;  %v1253_v47 = vld [vmem:[%s2021_s3 + $0x3] ss:$8 sm:$0x3] }
 0x174   : > { %v532_v22 = vpop.permute.xlu0 %531  ;;  %v538_v23 = vpop.permute.xlu1 %537  ;;  %v572_v25 = vpack.c.bf16 %v566_v20, %v564_v8  ;;  %v571_v26 = vpack.c.bf16 %v565_v12, %v563_v6  ;;  %v664_v12 = vrot.slane %v1253_v47, %v1624_v15  ;;  %v668_v20 = vrot.slane %v1253_v47, %v1622_v13 }
 0x175   : > { %v544_v28 = vsel %vm541_vm9, %v530_v2, %v538_v23  ;;  %v548_v9 = vsel %vm541_vm9, %v538_v23, %v530_v2 }
 0x176   : > { %1020 = vmatprep.subr.bf16.mxu1 %v572_v25  ;;  %v567_v38 = vmul.f32 %v556_v45, %v548_v9  ;;  %v568_v39 = vmul.f32 %v560_v58, %v544_v28 }
 0x177   : > { %1021 = vmatpush1.bf16.msra.mxu1 %v571_v26 }
 0x178   : > { %v540_v29 = vpop.permute.xlu0 %539  ;;  %v580_v34 = vpop.permute.xlu1 %579 }
 0x179   : > { %v545_v35 = vsel %vm541_vm9, %v532_v22, %v540_v29  ;;  %v549_v36 = vsel %vm541_vm9, %v540_v29, %v532_v22 }
 0x17a   : > { %v569_v17 = vmul.f32 %v556_v45, %v549_v36  ;;  %v570_v18 = vmul.f32 %v560_v58, %v545_v35 }
 0x17c   : > { %v582_v41 = vpop.permute.xlu0 %581  ;;  %v588_v42 = vpop.permute.xlu1 %587  ;;  %v574_v27 = vpack.c.bf16 %v570_v18, %v568_v39  ;;  %v573_v30 = vpack.c.bf16 %v569_v17, %v567_v38 }
 0x17d   : > { %v596_v48 = vsel %vm595_vm10, %v580_v34, %v588_v42  ;;  %v600_v49 = vsel %vm595_vm10, %v588_v42, %v580_v34 }
 0x17e   : > { %1022 = vmatprep.subr.bf16.mxu1 %v574_v27  ;;  %v617_v53 = vmul.f32 %v610_v43, %v600_v49  ;;  %v618_v54 = vmul.f32 %v614_v31, %v596_v48 }
 0x17f   : > { %1023 = vmatpush1.bf16.msra.mxu1 %v573_v30 }
 0x180   : > { %v590_v50 = vpop.permute.xlu0 %589  ;;  %v584_v32 = vpop.permute.xlu1 %583 }
 0x181   : > { %v597_v51 = vsel %vm595_vm10, %v582_v41, %v590_v50  ;;  %v601_v52 = vsel %vm595_vm10, %v590_v50, %v582_v41 }
 0x182   : > { %v619_v55 = vmul.f32 %v610_v43, %v601_v52  ;;  %v620_v24 = vmul.f32 %v614_v31, %v597_v51 }
 0x184   : > { %v586_v56 = vpop.permute.xlu0 %585  ;;  %v592_v33 = vpop.permute.xlu1 %591  ;;  %v626_v37 = vpack.c.bf16 %v620_v24, %v618_v54  ;;  %v625_v57 = vpack.c.bf16 %v619_v55, %v617_v53  ;;  %v1254_v54 = vld [vmem:[%s2021_s3 + $0x5] ss:$8 sm:$0x3]  ;;  %v688_v55 = vpack.c.bf16 %v1660_v7, %v1644_v10  ;;  %v690_v10 = vpack.c.bf16 %v1676_v19, %v1670_v16 }
 0x185   : > { %v598_v59 = vsel %vm595_vm10, %v584_v32, %v592_v33  ;;  %v602_v44 = vsel %vm595_vm10, %v592_v33, %v584_v32  ;;  %v730_v24 = vrot.slane %v1254_v54, %v1622_v13  ;;  %v726_v7 = vrot.slane %v1254_v54, %v1624_v15 }
 0x186   : > { %1024 = vmatprep.subr.bf16.mxu1 %v626_v37  ;;  %v621_v46 = vmul.f32 %v610_v43, %v602_v44  ;;  %v622_v62 = vmul.f32 %v614_v31, %v598_v59  ;;  %v687_v59 = vpack.c.bf16 %v1656_v0, %v1640_v5  ;;  %v689_v5 = vpack.c.bf16 %v1668_v14, %v1662_v11 }
 0x187   : > { %1025 = vmatpush1.bf16.msra.mxu1 %v625_v57 }
 0x188   : > { %v594_v60 = vpop.permute.xlu0 %593  ;;  %v634_v61 = vpop.permute.xlu1 %633 }
 0x189   : > { %v599_v45 = vsel %vm595_vm10, %v586_v56, %v594_v60  ;;  %v603_v58 = vsel %vm595_vm10, %v594_v60, %v586_v56 }
 0x18a   : > { %v623_v63 = vmul.f32 %v610_v43, %v603_v58  ;;  %v624_v2 = vmul.f32 %v614_v31, %v599_v45 }
 0x18c   : > { %v636_v3 = vpop.permute.xlu0 %635  ;;  %v642_v4 = vpop.permute.xlu1 %641  ;;  %v628_v6 = vpack.c.bf16 %v624_v2, %v622_v62  ;;  %v627_v8 = vpack.c.bf16 %v623_v63, %v621_v46 }
 0x18d   : > { %v650_v22 = vsel %vm649_vm11, %v634_v61, %v642_v4  ;;  %v654_v23 = vsel %vm649_vm11, %v642_v4, %v634_v61 }
 0x18e   : > { %1026 = vmatprep.subr.bf16.mxu1 %v628_v6  ;;  %v671_v29 = vmul.f32 %v664_v12, %v654_v23  ;;  %v672_v34 = vmul.f32 %v668_v20, %v650_v22 }
 0x18f   : > { %1027 = vmatpush1.bf16.msra.mxu1 %v627_v8 }
 0x190   : > { %v644_v25 = vpop.permute.xlu0 %643  ;;  %v638_v26 = vpop.permute.xlu1 %637 }
 0x191   : > { %v651_v28 = vsel %vm649_vm11, %v636_v3, %v644_v25  ;;  %v655_v9 = vsel %vm649_vm11, %v644_v25, %v636_v3 }
 0x192   : > { %v673_v35 = vmul.f32 %v664_v12, %v655_v9  ;;  %v674_v36 = vmul.f32 %v668_v20, %v651_v28 }
 0x194   : > { %v640_v38 = vpop.permute.xlu0 %639  ;;  %v646_v39 = vpop.permute.xlu1 %645  ;;  %v680_v17 = vpack.c.bf16 %v674_v36, %v672_v34  ;;  %v679_v18 = vpack.c.bf16 %v673_v35, %v671_v29 }
 0x195   : > { %v652_v40 = vsel %vm649_vm11, %v638_v26, %v646_v39  ;;  %v656_v41 = vsel %vm649_vm11, %v646_v39, %v638_v26 }
 0x196   : > { %1028 = vmatprep.subr.bf16.mxu1 %v680_v17  ;;  %v675_v31 = vmul.f32 %v664_v12, %v656_v41  ;;  %v676_v48 = vmul.f32 %v668_v20, %v652_v40 }
 0x197   : > { %1029 = vmatpush1.bf16.msra.mxu1 %v679_v18 }
 0x198   : > { %v648_v42 = vpop.permute.xlu0 %647  ;;  %v696_v27 = vpop.permute.xlu1 %695 }
 0x199   : > { %v653_v30 = vsel %vm649_vm11, %v640_v38, %v648_v42  ;;  %v657_v43 = vsel %vm649_vm11, %v648_v42, %v640_v38 }
 0x19a   : > { %v677_v49 = vmul.f32 %v664_v12, %v657_v43  ;;  %v678_v50 = vmul.f32 %v668_v20, %v653_v30  ;;  %v1255_v20 = vld [vmem:[%s2021_s3 + $0x6] ss:$8 sm:$0x3] }
 0x19b   : > { %v780_v28 = vrot.slane %v1255_v20, %v1624_v15  ;;  %v784_v9 = vrot.slane %v1255_v20, %v1622_v13 }
 0x19c   : > { %v698_v32 = vpop.permute.xlu0 %697  ;;  %v704_v51 = vpop.permute.xlu1 %703  ;;  %v682_v52 = vpack.c.bf16 %v678_v50, %v676_v48  ;;  %v681_v53 = vpack.c.bf16 %v677_v49, %v675_v31 }
 0x19d   : > { %v716_v37 = vsel %vm711_vm12, %v704_v51, %v696_v27  ;;  %v712_v61 = vsel %vm711_vm12, %v696_v27, %v704_v51 }
 0x19e   : > { %1030 = vmatprep.subr.bf16.mxu1 %v682_v52  ;;  %v734_v45 = vmul.f32 %v730_v24, %v716_v37  ;;  %v733_v63 = vmul.f32 %v726_v7, %v712_v61 }
 0x19f   : > { %1031 = vmatpush1.bf16.msra.mxu1 %v681_v53 }
 0x1a0   : > { %v706_v56 = vpop.permute.xlu0 %705  ;;  %1032 = vmatprep.subr.bf16.mxu1 %v688_v55  ;;  %v700_v33 = vpop.permute.xlu1 %699 }
 0x1a1   : > { %v717_v57 = vsel %vm711_vm12, %v706_v56, %v698_v32  ;;  %v713_v44 = vsel %vm711_vm12, %v698_v32, %v706_v56 }
 0x1a2   : > { %v736_v60 = vmul.f32 %v730_v24, %v717_v57  ;;  %v735_v62 = vmul.f32 %v726_v7, %v713_v44 }
 0x1a3   : > { %1033 = vmatpush1.bf16.msra.mxu1 %v687_v59 }
 0x1a4   : > { %v702_v58 = vpop.permute.xlu0 %701  ;;  %v708_v46 = vpop.permute.xlu1 %707  ;;  %1034 = vmatprep.subr.bf16.mxu1 %v690_v10  ;;  %v742_v0 = vpack.c.bf16 %v736_v60, %v734_v45  ;;  %v741_v6 = vpack.c.bf16 %v735_v62, %v733_v63  ;;  %v1257_v63 = vld [vmem:[%s2021_s3 + $0x10] ss:$8 sm:$0x3] }
 0x1a5   : > { %v714_v2 = vsel %vm711_vm12, %v700_v33, %v708_v46  ;;  %v718_v16 = vsel %vm711_vm12, %v708_v46, %v700_v33 }
 0x1a6   : > { %v737_v11 = vmul.f32 %v726_v7, %v714_v2  ;;  %v738_v14 = vmul.f32 %v730_v24, %v718_v16 }
 0x1a7   : > { %1035 = vmatpush1.bf16.msra.mxu1 %v689_v5 }
 0x1a8   : > { %v710_v19 = vpop.permute.xlu0 %709  ;;  %v750_v47 = vpop.permute.xlu1 %749  ;;  %1036 = vmatprep.subr.bf16.mxu1 %v742_v0 }
 0x1a9   : > { %v715_v3 = vsel %vm711_vm12, %v702_v58, %v710_v19  ;;  %v719_v4 = vsel %vm711_vm12, %v710_v19, %v702_v58 }
 0x1aa   : > { %v739_v8 = vmul.f32 %v726_v7, %v715_v3  ;;  %v740_v12 = vmul.f32 %v730_v24, %v719_v4  ;;  %v1256_v24 = vld [vmem:[%s2021_s3 + $0x7] ss:$8 sm:$0x3]  ;;  %v888_v3 = vrot.slane %v1257_v63, %v1624_v15  ;;  %v892_v4 = vrot.slane %v1257_v63, %v1622_v13 }
 0x1ab   : > { %1037 = vmatpush1.bf16.msra.mxu1 %v741_v6  ;;  %v834_v59 = vrot.slane %v1256_v24, %v1624_v15  ;;  %v838_v44 = vrot.slane %v1256_v24, %v1622_v13 }
 0x1ac   : > { %v752_v22 = vpop.permute.xlu0 %751  ;;  %v758_v23 = vpop.permute.xlu1 %757  ;;  %v744_v25 = vpack.c.bf16 %v740_v12, %v738_v14  ;;  %v743_v26 = vpack.c.bf16 %v739_v8, %v737_v11 }
 0x1ad   : > { %v766_v29 = vsel %vm765_vm13, %v750_v47, %v758_v23  ;;  %v770_v34 = vsel %vm765_vm13, %v758_v23, %v750_v47 }
 0x1ae   : > { %1038 = vmatprep.subr.bf16.mxu1 %v744_v25  ;;  %v787_v17 = vmul.f32 %v780_v28, %v766_v29  ;;  %v788_v18 = vmul.f32 %v784_v9, %v770_v34 }
 0x1af   : > { %1039 = vmatpush1.bf16.msra.mxu1 %v743_v26 }
 0x1b0   : > { %v760_v35 = vpop.permute.xlu0 %759  ;;  %v754_v36 = vpop.permute.xlu1 %753 }
 0x1b1   : > { %v767_v38 = vsel %vm765_vm13, %v752_v22, %v760_v35  ;;  %v771_v39 = vsel %vm765_vm13, %v760_v35, %v752_v22 }
 0x1b2   : > { %v789_v40 = vmul.f32 %v780_v28, %v767_v38  ;;  %v790_v41 = vmul.f32 %v784_v9, %v771_v39 }
 0x1b4   : > { %v756_v42 = vpop.permute.xlu0 %755  ;;  %v762_v27 = vpop.permute.xlu1 %761  ;;  %v796_v30 = vpack.c.bf16 %v790_v41, %v788_v18  ;;  %v795_v43 = vpack.c.bf16 %v789_v40, %v787_v17 }
 0x1b5   : > { %v768_v31 = vsel %vm765_vm13, %v754_v36, %v762_v27  ;;  %v772_v48 = vsel %vm765_vm13, %v762_v27, %v754_v36 }
 0x1b6   : > { %1040 = vmatprep.subr.bf16.mxu1 %v796_v30  ;;  %v791_v52 = vmul.f32 %v780_v28, %v768_v31  ;;  %v792_v53 = vmul.f32 %v784_v9, %v772_v48  ;;  %v1370_v31 = vld [vmem:[#allocation3] ss:$12 sps:$4 sm:$0xff]  }
 0x1b7   : > { %1041 = vmatpush1.bf16.msra.mxu1 %v795_v43 }
 0x1b8   : > { %v764_v49 = vpop.permute.xlu0 %763  ;;  %v804_v50 = vpop.permute.xlu1 %803 }
 0x1b9   : > { %v769_v32 = vsel %vm765_vm13, %v756_v42, %v764_v49  ;;  %v773_v51 = vsel %vm765_vm13, %v764_v49, %v756_v42 }
 0x1ba   : > { %v793_v54 = vmul.f32 %v780_v28, %v769_v32  ;;  %v794_v55 = vmul.f32 %v784_v9, %v773_v51 }
 0x1bc   : > { %v806_v56 = vpop.permute.xlu0 %805  ;;  %v812_v33 = vpop.permute.xlu1 %811  ;;  %v798_v37 = vpack.c.bf16 %v794_v55, %v792_v53  ;;  %v797_v57 = vpack.c.bf16 %v793_v54, %v791_v52 }
 0x1bd   : > { %v820_v60 = vsel %vm819_vm14, %v804_v50, %v812_v33  ;;  %v824_v10 = vsel %vm819_vm14, %v812_v33, %v804_v50  ;;  %v1373_v50 = vld [vmem:[#allocation3 + $0x1c] ss:$12 sps:$4 sm:$0xff]  }
 0x1be   : > { %1042 = vmatprep.subr.bf16.mxu1 %v798_v37  ;;  %v841_v46 = vmul.f32 %v834_v59, %v820_v60  ;;  %v842_v62 = vmul.f32 %v838_v44, %v824_v10  ;;  %v1375_v37 = vld [vmem:[#allocation3 + $0x18] ss:$12 sps:$4 sm:$0xff]  }
 0x1bf   : > { %1043 = vmatpush1.bf16.msra.mxu1 %v797_v57  ;;  %v1376_v57 = vld [vmem:[#allocation3 + $0x8] ss:$12 sps:$4 sm:$0xff]  }
 0x1c0   : > { %v814_v7 = vpop.permute.xlu0 %813  ;;  %v858_v61 = vpop.permute.xlu1 %857 }
 0x1c1   : > { %v821_v45 = vsel %vm819_vm14, %v806_v56, %v814_v7  ;;  %v825_v58 = vsel %vm819_vm14, %v814_v7, %v806_v56 }
 0x1c2   : > { %v843_v5 = vmul.f32 %v834_v59, %v821_v45  ;;  %v844_v0 = vmul.f32 %v838_v44, %v825_v58 }
 0x1c4   : > { %v860_v2 = vpop.permute.xlu0 %859  ;;  %v866_v16 = vpop.permute.xlu1 %865  ;;  %v850_v19 = vpack.c.bf16 %v844_v0, %v842_v62  ;;  %v849_v47 = vpack.c.bf16 %v843_v5, %v841_v46 }
 0x1c5   : > { %v874_v6 = vsel %vm873_vm15, %v858_v61, %v866_v16  ;;  %v878_v11 = vsel %vm873_vm15, %v866_v16, %v858_v61 }
 0x1c6   : > { %1044 = vmatprep.subr.bf16.mxu1 %v850_v19  ;;  %v895_v22 = vmul.f32 %v888_v3, %v874_v6  ;;  %v896_v23 = vmul.f32 %v892_v4, %v878_v11 }
 0x1c7   : > { %1045 = vmatpush1.bf16.msra.mxu1 %v849_v47 }
 0x1c8   : > { %v868_v14 = vpop.permute.xlu0 %867  ;;  %v808_v8 = vpop.permute.xlu1 %807 }
 0x1c9   : > { %v875_v12 = vsel %vm873_vm15, %v860_v2, %v868_v14  ;;  %v879_v20 = vsel %vm873_vm15, %v868_v14, %v860_v2 }
 0x1ca   : > { %v897_v15 = vmul.f32 %v888_v3, %v875_v12  ;;  %v898_v25 = vmul.f32 %v892_v4, %v879_v20 }
 0x1cc   : > { %v810_v13 = vpop.permute.xlu0 %809  ;;  %v816_v26 = vpop.permute.xlu1 %815  ;;  %v904_v28 = vpack.c.bf16 %v898_v25, %v896_v23  ;;  %v903_v9 = vpack.c.bf16 %v897_v15, %v895_v22 }
 0x1cd   : > { %v822_v29 = vsel %vm819_vm14, %v808_v8, %v816_v26  ;;  %v826_v34 = vsel %vm819_vm14, %v816_v26, %v808_v8 }
 0x1ce   : > { %1069 = vmatprep.subr.bf16.mxu0 %v904_v28  ;;  %v845_v17 = vmul.f32 %v834_v59, %v822_v29  ;;  %v846_v18 = vmul.f32 %v838_v44, %v826_v34 }
 0x1cf   : > { %1070 = vmatpush1.bf16.msra.mxu0 %v903_v9 }
 0x1d0   : > { %v818_v35 = vpop.permute.xlu0 %817  ;;  %v862_v36 = vpop.permute.xlu1 %861 }
 0x1d1   : > { %v823_v38 = vsel %vm819_vm14, %v810_v13, %v818_v35  ;;  %v827_v39 = vsel %vm819_vm14, %v818_v35, %v810_v13 }
 0x1d2   : > { %v847_v40 = vmul.f32 %v834_v59, %v823_v38  ;;  %v848_v41 = vmul.f32 %v838_v44, %v827_v39 }
 0x1d4   : > { %v864_v42 = vpop.permute.xlu0 %863  ;;  %v870_v27 = vpop.permute.xlu1 %869  ;;  %v852_v30 = vpack.c.bf16 %v848_v41, %v846_v18  ;;  %v851_v43 = vpack.c.bf16 %v847_v40, %v845_v17 }
 0x1d5   : > { %v876_v48 = vsel %vm873_vm15, %v862_v36, %v870_v27  ;;  %v880_v49 = vsel %vm873_vm15, %v870_v27, %v862_v36 }
 0x1d6   : > { %1046 = vmatprep.subr.bf16.mxu1 %v852_v30  ;;  %v899_v53 = vmul.f32 %v888_v3, %v876_v48  ;;  %v900_v54 = vmul.f32 %v892_v4, %v880_v49 }
 0x1d7   : > { %1047 = vmatpush1.bf16.msra.mxu1 %v851_v43 }
 0x1d8   : > { %v872_v32 = vpop.permute.xlu0 %871 }
 0x1d9   : > { %v877_v51 = vsel %vm873_vm15, %v864_v42, %v872_v32  ;;  %v881_v52 = vsel %vm873_vm15, %v872_v32, %v864_v42 }
 0x1da   : > { %v901_v55 = vmul.f32 %v888_v3, %v877_v51  ;;  %v902_v24 = vmul.f32 %v892_v4, %v881_v52  ;;  %1049 = vmatmul.mubr.bf16.vlgmr.msra.gmra.mrb[0].mxu1 %v1370_v31 }
 0x1db   : > { %1058 = vmatprep.mubr.bf16.mxu1 %v1373_v50 }
 0x1dc   : > { %v906_v56 = vpack.c.bf16 %v902_v24, %v900_v54  ;;  %v905_v33 = vpack.c.bf16 %v901_v55, %v899_v53 }
 0x1de   : > { %1071 = vmatprep.subr.bf16.mxu0 %v906_v56 }
 0x1df   : > { %1072 = vmatpush1.bf16.msra.mxu0 %v905_v33 }
 0x1e2   : > { %1059 = vmatmul.mubr.bf16.gmra.mrb[4].mxu1 %v1375_v37  ;;  %1264 = vmatmul.mubr.msk.bf16.vlgmr.msra.gmra.mrb[0].mxu0 %vm1009_vm0, %v1376_v57 }
 0x1e3   : > { %1111 = vmatprep.mubr.bf16.mxu0 %v1478_v1 }
 0x1e6   : > { %v962_v44 = vpop.permute.xlu1 %961 }
 0x1e9   : > { %v967_v58 = vpop.permute.xlu0 %966 }
 0x1ea   : > { %1265 = vmatmul.mubr.msk.bf16.gmra.mrb[4].mxu0 %vm1009_vm0, %v1377_v21  ;;  %v972_v46 = vpop.permute.xlu1 %971 }
 0x1ee   : > { %v977_v23 = vpop.permute.xlu1 %976 }
 0x2ad   : > { %v1050_v59 = vpop.f32.mrb[0].mxu1 }
 0x2ae   : > { %v1052_v60 = vpop.f32.mrb[1].mxu1  ;;  %v1051_v61 = vadd.f32 %v1050_v59, %v962_v44 }
 0x2af   : > { %v1054_v10 = vpop.f32.mrb[2].mxu1  ;;  %v1053_v45 = vadd.f32 %v1052_v60, %v962_v44 }
 0x2b0   : > { %v1056_v7 = vpop.f32.mrb[3].mxu1  ;;  %v1055_v0 = vadd.f32 %v1054_v10, %v967_v58 }
 0x2b1   : > { %v1057_v16 = vadd.f32 %v1056_v7, %v967_v58 }
 0x2b5   : > { %v1060_v62 = vpop.f32.mrb[4].mxu1  ;;  %v1103_v5 = vpop.f32.mrb[0].mxu0 }
 0x2b6   : > { %v1104_v63 = vadd.f32 %v1103_v5, %v1051_v61  ;;  %v1105_v2 = vpop.f32.mrb[1].mxu0  ;;  %v1062_v1 = vpop.f32.mrb[5].mxu1  ;;  %v1061_v13 = vadd.f32 %v1060_v62, %v972_v46 }
 0x2b7   : > { %v1106_v19 = vadd.f32 %v1105_v2, %v1053_v45  ;;  %v1064_v47 = vpop.f32.mrb[6].mxu1  ;;  %v1107_v3 = vpop.f32.mrb[2].mxu0  ;;  %v1063_v28 = vadd.f32 %v1062_v1, %v972_v46 }
 0x2b8   : > { %vm1122_vm1 = vcmp.ge.f32.partialorder %v1104_v63, 0.0  ;;  %v1130_v4 = vmul.f32 0.2, %v1104_v63  ;;  %v1108_v6 = vadd.f32 %v1107_v3, %v1055_v0  ;;  %v1066_v11 = vpop.f32.mrb[7].mxu1  ;;  %v1109_v14 = vpop.f32.mrb[3].mxu0  ;;  %v1065_v34 = vadd.f32 %v1064_v47, %v977_v23 }
 0x2b9   : > { %vm1123_vm2 = vcmp.ge.f32.partialorder %v1106_v19, 0.0  ;;  %v1131_v8 = vmul.f32 0.2, %v1106_v19  ;;  %v1110_v12 = vadd.f32 %v1109_v14, %v1057_v16  ;;  %v1067_v38 = vadd.f32 %v1066_v11, %v977_v23 }
 0x2ba   : > { %v1138_v20 = vsel %vm1122_vm1, %v1104_v63, %v1130_v4  ;;  %vm1124_vm3 = vcmp.ge.f32.partialorder %v1108_v6, 0.0  ;;  %v1132_v22 = vmul.f32 0.2, %v1108_v6 }
 0x2bb   : > { %1146 = vst [vmem:[%s1955_s20] sm:$0xff] %v1138_v20  ;;  %v1139_v15 = vsel %vm1123_vm2, %v1106_v19, %v1131_v8  ;;  %vm1125_vm4 = vcmp.ge.f32.partialorder %v1110_v12, 0.0  ;;  %v1133_v25 = vmul.f32 0.2, %v1110_v12 }
 0x2bc   : > { %1147 = vst [vmem:[%s1955_s20 + $0x8] sm:$0xff] %v1139_v15  ;;  %v1140_v26 = vsel %vm1124_vm3, %v1108_v6, %v1132_v22 }
 0x2bd   : > { %1148 = vst [vmem:[%s1955_s20 + $0x10] sm:$0xff] %v1140_v26  ;;  %v1141_v9 = vsel %vm1125_vm4, %v1110_v12, %v1133_v25  ;;  %v1113_v29 = vpop.f32.mrb[4].mxu0 }
 0x2be   : > { %1149 = vst [vmem:[%s1955_s20 + $0x18] sm:$0xff] %v1141_v9  ;;  %v1114_v35 = vadd.f32 %v1113_v29, %v1061_v13  ;;  %v1115_v36 = vpop.f32.mrb[5].mxu0 }
 0x2bf   : > { %v1116_v39 = vadd.f32 %v1115_v36, %v1063_v28  ;;  %v1117_v17 = vpop.f32.mrb[6].mxu0 }
 0x2c0   : > { %vm1126_vm5 = vcmp.ge.f32.partialorder %v1114_v35, 0.0  ;;  %v1134_v18 = vmul.f32 0.2, %v1114_v35  ;;  %v1118_v40 = vadd.f32 %v1117_v17, %v1065_v34  ;;  %v1119_v41 = vpop.f32.mrb[7].mxu0 }
 0x2c1   : > { %vm1127_vm6 = vcmp.ge.f32.partialorder %v1116_v39, 0.0  ;;  %v1135_v42 = vmul.f32 0.2, %v1116_v39  ;;  %v1120_v27 = vadd.f32 %v1119_v41, %v1067_v38 }
 0x2c2   : > { %v1142_v30 = vsel %vm1126_vm5, %v1114_v35, %v1134_v18  ;;  %vm1128_vm7 = vcmp.ge.f32.partialorder %v1118_v40, 0.0  ;;  %v1136_v43 = vmul.f32 0.2, %v1118_v40 }
 0x2c3   : > { %1150 = vst [vmem:[%s1955_s20 + $0x20] sm:$0xff] %v1142_v30  ;;  %v1143_v31 = vsel %vm1127_vm6, %v1116_v39, %v1135_v42  ;;  %vm1129_vm8 = vcmp.ge.f32.partialorder %v1120_v27, 0.0  ;;  %v1137_v48 = vmul.f32 0.2, %v1120_v27 }
 0x2c4   : > { %1151 = vst [vmem:[%s1955_s20 + $0x28] sm:$0xff] %v1143_v31  ;;  %v1144_v49 = vsel %vm1128_vm7, %v1118_v40, %v1136_v43 }
 0x2c5   : > { %1152 = vst [vmem:[%s1955_s20 + $0x30] sm:$0xff] %v1144_v49  ;;  %v1145_v50 = vsel %vm1129_vm8, %v1120_v27, %v1137_v48 }
 0x2c6   : > { %1153 = vst [vmem:[%s1955_s20 + $0x38] sm:$0xff] %v1145_v50 }
 0x2c7   : > { %1419 = shalt.err (!%p1416_p7)
}
 0x2c8   : > { %s1420_s8 = scalar_lea.hbm %s1970_s29, 1024  ;;  %s1424_s11 = scalar_lea.hbm %s2022_s4, 2048 }
 0x2c9   : > { %p1421_p8 = scmp.ne.s32.totalorder %s1970_s29, %s1420_s8  ;;  %p1425_p1 = scmp.lt.u32.totalorder %s1970_s29, %s2022_s4 }
 0x2ca   : > { %p1426_p0 = scmp.lt.u32.totalorder %s1424_s11, %s1420_s8  ;;  %p1428_p6 = scmp.lt.u32.totalorder %s1420_s8, %s1970_s29 }
 0x2cb   : > { %p1422_p11 = pnand %p1421_p8, %p2033_p9 }
 0x2cc   : > { %p1427_p5 = por %p1426_p0, %p1425_p1 }
 0x2cd   : > { %p1423_p13 = pneg %p1422_p11 }
 0x2ce   : > { %p1429_p10 = por %p1428_p6, %p1427_p5 }
 0x2d0   : > { %p1430_p12 = pnand %p1429_p10, %p1423_p13 }
 0x2d2   : > { %1433 = shalt.err (!%p1430_p12)
}
 0x2d3   : > { %s1492_s20 = smov 256  }
 0x2d4   : > { %1293 = dma.vmem_to_hbm [thread:$0]  (%p2033_p9), %s1963_s22, 1024, %s1970_s29, %s1976_s19, %s1492_s20, %s1492_s20, %s1483_s14  }
 0x2d5 PF: > { %p1305_p2 = scmp.ge.s32.totalorder %s1472_s18, 2  ;;  %s1183_s23 = sand.u32 1, %s1460_s15  }
 0x2d6   : > { %p2034_p3 = scmp.ne.s32.totalorder %s2027_s26, 0  ;;  %s1184_s28 = scalar_lea.sflag [#allocation5], %s1183_s23 }
 0x2d8   : > { %p1300_p4 = pnand %p1305_p2, %p2034_p3 }
 0x2da   : > { %1455 = dma.done.wait (!%p1300_p4), %s1184_s28, 1024  }
 0x2db   : > { %1457 = vsyncadd (!%p1300_p4), %s1184_s28, 4294966272  ;;  %p15_p7 = scmp.ge.s32.totalorder %s1543_s21, 4   ;;  %s2035_s15 = smov %s1464_s16 }
 0x2dc   : > { %s2036_s16 = smov %s1468_s17  ;;  %s2037_s17 = smov %s1554_s24 }
 0x2dd   : > { %s2038_s18 = smov %s1543_s21  ;;  %17 = sbr.rel (!%p15_p7) target bundleno = 4 (0x4), region = 83 }
 0x2e4   :  { %1189 = vsyncpa [#allocation4], 1 }
 0x2e5   :  { %1191 = vsyncpa [#allocation4 + $0x1], 1 }
 0x2e6   :  { %1192 = vsyncpa [#allocation5], 1 }
 0x2e7   :  { %1194 = vsyncpa [#allocation5 + $0x1], 1 }

</bundles_post_ra>
